<compile_context>
chip_gen: v5e
topology: v5e:2x2
jax: 0.10.0
libtpu: 0.0.40
codegen_flags: <defaults>
</compile_context>

<pallas_src>
import functools
from typing import Any

import jax
import jax.numpy as jnp
from jax.experimental import pallas as pl
from jax.experimental.pallas import tpu as pltpu


# ----------------------------------------------------------------------------
# Helpers
# ----------------------------------------------------------------------------

def _round_up(x, m):
    return (x + m - 1) // m * m


@functools.lru_cache(maxsize=None)
def _device_kind():
    try:
        return jax.devices()[0].device_kind.lower()
    except Exception:
        return ""


@functools.lru_cache(maxsize=None)
def _num_tc_per_chip():
    k = _device_kind()
    return 2 if ("v7" in k or "tpu7" in k) else 1


def _default_linear_tiles():
    """MXU-aligned default (tm, tn, tk) per TPU generation."""
    k = _device_kind()
    if "v5 lite" in k or "v5e" in k or "v5lite" in k:
        # v5e: 4x128x128 MXU, single vst slot -> bigger tk cuts acc writebacks.
        return 128, 256, 512
    # v6e / v7x: 2x256x256 MXU, lots of VMEM headroom.
    return 512, 256, 1024


def _divisor_tile(dim_p, granule, max_tile):
    """Largest multiple of `granule` that divides dim_p and is <= max_tile."""
    best = granule
    t = granule
    limit = min(dim_p, max_tile)
    while t <= limit:
        if dim_p % t == 0:
            best = t
        t += granule
    return best


def _maybe_split_for_cores(Mp, Np, tm, tn):
    """On dual-TC chips (v7x), make sure the parallel grid has >= 2 blocks."""
    if _num_tc_per_chip() < 2:
        return tm, tn
    if (Mp // tm) * (Np // tn) >= 2:
        return tm, tn
    if Np >= 256:
        tn = _divisor_tile(Np, 128, max(128, Np // 2))
    elif Mp >= 16 and Mp % 16 == 0:
        tm = Mp // 2
    return tm, tn


# ----------------------------------------------------------------------------
# Fused Linear (+bias [+tanh] [+scale]) Pallas kernels
# ----------------------------------------------------------------------------

def _linear_kernel_single_k(x_ref, w_ref, b_ref, *rest, activation, has_scale):
    """Whole-K-in-one-tile path: no accumulator scratch, direct epilogue."""
    if has_scale:
        scale_ref, o_ref = rest
    else:
        (o_ref,) = rest
        scale_ref = None
    y = jnp.dot(x_ref[...], w_ref[...], preferred_element_type=jnp.float32)
    y = y + b_ref[...]                      # f32 epilogue
    if activation == "tanh":
        y = jnp.tanh(y)                     # EUP slot
    if has_scale:
        y = y * scale_ref[0, 0]             # fold scale before the cast
    o_ref[...] = y.astype(o_ref.dtype)


def _linear_kernel_multi_k(x_ref, w_ref, b_ref, *rest, activation, has_scale):
    """K-tiled path with f32 VMEM accumulator and pl.when init/finalize."""
    if has_scale:
        scale_ref, o_ref, acc_ref = rest
    else:
        o_ref, acc_ref = rest
        scale_ref = None

    k = pl.program_id(2)

    @pl.when(k == 0)
    def _():
        acc_ref[...] = jnp.zeros_like(acc_ref)

    acc_ref[...] += jnp.dot(x_ref[...], w_ref[...],
                            preferred_element_type=jnp.float32)

    @pl.when(k == pl.num_programs(2) - 1)
    def _():
        y = acc_ref[...] + b_ref[...]
        if activation == "tanh":
            y = jnp.tanh(y)
        if has_scale:
            y = y * scale_ref[0, 0]
        o_ref[...] = y.astype(o_ref.dtype)


def pallas_linear(x, w_pad, b_pad, *, out_dim=None, scale=None, activation=None,
                  tm=None, tn=None, tk=None):
    """y = act(x @ W + b) [* scale].

    x: [M, K] (any float dtype), w_pad: [Kp, Np] in the MXU compute dtype
    (feature dims ideally pre-padded to multiples of 128), b_pad: [1, Np] f32.
    Returns [M, out_dim] in x.dtype.  Accumulation / bias / tanh / scale all
    run in f32 before the final cast.
    """
    if activation not in (None, "tanh"):
        raise ValueError(f"unsupported fused activation: {activation!r}")

    M, K = x.shape
    Kp0, Np0 = w_pad.shape
    out_dtype = x.dtype
    N = out_dim if out_dim is not None else Np0

    # Robustness: pad weights/bias here only if the caller didn't pre-pad.
    Kp, Np = _round_up(Kp0, 128), _round_up(Np0, 128)
    if (Kp, Np) != (Kp0, Np0):
        w_pad = jnp.pad(w_pad, ((0, Kp - Kp0), (0, Np - Np0)))
    b_pad = jnp.reshape(b_pad, (1, -1)).astype(jnp.float32)
    if b_pad.shape[1] != Np:
        b_pad = jnp.pad(b_pad, ((0, 0), (0, Np - b_pad.shape[1])))
    assert K <= Kp, (x.shape, w_pad.shape)

    dtm, dtn, dtk = _default_linear_tiles()
    tm = tm or dtm
    tn = tn or dtn
    tk = tk or dtk

    Mp0 = _round_up(M, 8)
    tm = min(tm, Mp0)
    Mp = _round_up(Mp0, tm)
    tn = _divisor_tile(Np, 128, tn)
    tk = _divisor_tile(Kp, 128, tk)
    tm, tn = _maybe_split_for_cores(Mp, Np, tm, tn)

    cdt = w_pad.dtype
    xp = x.astype(cdt)
    if (Mp, Kp) != (M, K):
        xp = jnp.pad(xp, ((0, Mp - M), (0, Kp - K)))

    has_scale = scale is not None
    n_k = Kp // tk

    if n_k == 1:
        kernel = functools.partial(_linear_kernel_single_k,
                                   activation=activation, has_scale=has_scale)
        grid = (Mp // tm, Np // tn)
        in_specs = [
            pl.BlockSpec((tm, Kp), lambda i, j: (i, 0)),
            pl.BlockSpec((Kp, tn), lambda i, j: (0, j)),
            pl.BlockSpec((1, tn), lambda i, j: (0, j)),
        ]
        out_specs = pl.BlockSpec((tm, tn), lambda i, j: (i, j))
        scratch = []
        dims = ("parallel", "parallel")
    else:
        kernel = functools.partial(_linear_kernel_multi_k,
                                   activation=activation, has_scale=has_scale)
        grid = (Mp // tm, Np // tn, n_k)
        in_specs = [
            pl.BlockSpec((tm, tk), lambda i, j, k: (i, k)),
            # If profiling shows exposed DMA on the weight stream (most likely
            # on v5e), add pipeline_mode=pl.Buffered(3) to this spec.
            pl.BlockSpec((tk, tn), lambda i, j, k: (k, j)),
            pl.BlockSpec((1, tn), lambda i, j, k: (0, j)),
        ]
        out_specs = pl.BlockSpec((tm, tn), lambda i, j, k: (i, j))
        scratch = [pltpu.VMEM((tm, tn), jnp.float32)]
        dims = ("parallel", "parallel", "arbitrary")

    operands = [xp, w_pad, b_pad]
    if has_scale:
        in_specs.append(pl.BlockSpec(memory_space=pltpu.MemorySpace.SMEM))
        operands.append(jnp.asarray(scale, dtype=jnp.float32).reshape(1, 1))

    out = pl.pallas_call(
        kernel,
        out_shape=jax.ShapeDtypeStruct((Mp, Np), out_dtype),
        grid=grid,
        in_specs=in_specs,
        out_specs=out_specs,
        scratch_shapes=scratch,
        compiler_params=pltpu.CompilerParams(dimension_semantics=dims),
    )(*operands)

    if (Mp, Np) != (M, N):
        out = out[:M, :N]
    return out


# ----------------------------------------------------------------------------
# Fused two-matmul (Linear -> Linear) kernel: hidden activation stays in VMEM
# ----------------------------------------------------------------------------

def _mlp_kernel(x_ref, w1_ref, b1_ref, w2_ref, b2_ref, *rest,
                act1, act2, has_scale1, has_scale2):
    i = 0
    s1_ref = s2_ref = None
    if has_scale1:
        s1_ref = rest[i]; i += 1
    if has_scale2:
        s2_ref = rest[i]; i += 1
    o_ref = rest[i]

    h = jnp.dot(x_ref[...], w1_ref[...], preferred_element_type=jnp.float32)
    h = h + b1_ref[...]
    if act1 == "tanh":
        h = jnp.tanh(h)
    if has_scale1:
        h = h * s1_ref[0, 0]
    y = jnp.dot(h.astype(w2_ref.dtype), w2_ref[...],
                preferred_element_type=jnp.float32)
    y = y + b2_ref[...]
    if act2 == "tanh":
        y = jnp.tanh(y)
    if has_scale2:
        y = y * s2_ref[0, 0]
    o_ref[...] = y.astype(o_ref.dtype)


def pallas_mlp(x, lin1, lin2, kw1, kw2, *, tm=None,
               vmem_budget=20 * 1024 * 1024):
    """Fused y = act2(act1(x @ W1 + b1)[*s1] @ W2 + b2)[*s2].

    Used when both weight matrices fit comfortably in VMEM; otherwise returns
    None and the caller falls back to two pallas_linear calls.
    """
    act1 = kw1.get("activation")
    act1 = act1 if act1 is not None else lin1.activation
    act2 = kw2.get("activation")
    act2 = act2 if act2 is not None else lin2.activation
    if act1 not in (None, "tanh") or act2 not in (None, "tanh"):
        return None
    scale1, scale2 = kw1.get("scale"), kw2.get("scale")

    cdt1 = kw1.get("compute_dtype") or lin1.compute_dtype
    cdt2 = kw2.get("compute_dtype") or lin2.compute_dtype
    w1, b1 = lin1.w_pad, lin1.b_pad
    w2, b2 = lin2.w_pad, lin2.b_pad
    if w1.dtype != jnp.dtype(cdt1):
        w1 = w1.astype(cdt1)
    if w2.dtype != jnp.dtype(cdt2):
        w2 = w2.astype(cdt2)

    if x.ndim != 2:
        return None
    M, K = x.shape
    Kp, Hp = w1.shape
    Hp2, Np = w2.shape
    if Hp2 != Hp or K != lin1.d_in or K > Kp:
        return None
    out_dtype = x.dtype

    dtm = tm or _default_linear_tiles()[0]
    Mp0 = _round_up(M, 8)
    tm_ = min(dtm, Mp0)
    Mp = _round_up(Mp0, tm_)
    # Give both TensorCores of a dual-TC chip (v7x) at least one M block.
    if _num_tc_per_chip() >= 2 and Mp // tm_ < 2 and Mp >= 16 and Mp % 16 == 0:
        tm_ = Mp // 2

    sz1 = jnp.dtype(cdt1).itemsize
    sz2 = jnp.dtype(cdt2).itemsize
    szo = jnp.dtype(out_dtype).itemsize
    footprint = (2 * tm_ * Kp * sz1
                 + 2 * (Kp * Hp * sz1 + Hp * Np * sz2)
                 + 2 * (Hp + Np) * 4
                 + 2 * tm_ * Np * szo
                 + tm_ * Hp * 4 + tm_ * Np * 4)
    if footprint > vmem_budget:
        return None

    xp = x.astype(cdt1)
    if (Mp, Kp) != (M, K):
        xp = jnp.pad(xp, ((0, Mp - M), (0, Kp - K)))

    has_s1, has_s2 = scale1 is not None, scale2 is not None
    kernel = functools.partial(_mlp_kernel, act1=act1, act2=act2,
                               has_scale1=has_s1, has_scale2=has_s2)
    in_specs = [
        pl.BlockSpec((tm_, Kp), lambda i: (i, 0)),
        pl.BlockSpec((Kp, Hp), lambda i: (0, 0)),
        pl.BlockSpec((1, Hp), lambda i: (0, 0)),
        pl.BlockSpec((Hp, Np), lambda i: (0, 0)),
        pl.BlockSpec((1, Np), lambda i: (0, 0)),
    ]
    operands = [xp, w1, b1, w2, b2]
    for has, s in ((has_s1, scale1), (has_s2, scale2)):
        if has:
            in_specs.append(pl.BlockSpec(memory_space=pltpu.MemorySpace.SMEM))
            operands.append(jnp.asarray(s, dtype=jnp.float32).reshape(1, 1))

    out = pl.pallas_call(
        kernel,
        out_shape=jax.ShapeDtypeStruct((Mp, Np), out_dtype),
        grid=(Mp // tm_,),
        in_specs=in_specs,
        out_specs=pl.BlockSpec((tm_, Np), lambda i: (i, 0)),
        compiler_params=pltpu.CompilerParams(
            dimension_semantics=("parallel",)),
    )(*operands)

    N = lin2.d_out
    if (Mp, Np) != (M, N):
        out = out[:M, :N]
    return out


# ----------------------------------------------------------------------------
# Standalone tiled tanh kernel (generic compositions; fusing is preferred)
# ----------------------------------------------------------------------------

def _tanh_kernel(x_ref, o_ref):
    o_ref[...] = jnp.tanh(x_ref[...].astype(jnp.float32)).astype(o_ref.dtype)


def pallas_tanh(x, *, tm=512, tn=1024):
    M, N = x.shape
    tm = min(tm, _round_up(M, 8))
    tn = min(tn, _round_up(N, 128))
    Mp, Np = _round_up(M, tm), _round_up(N, tn)
    xp = jnp.pad(x, ((0, Mp - M), (0, Np - N))) if (Mp, Np) != (M, N) else x
    out = pl.pallas_call(
        _tanh_kernel,
        out_shape=jax.ShapeDtypeStruct((Mp, Np), x.dtype),
        grid=(Mp // tm, Np // tn),
        in_specs=[pl.BlockSpec((tm, tn), lambda i, j: (i, j))],
        out_specs=pl.BlockSpec((tm, tn), lambda i, j: (i, j)),
        compiler_params=pltpu.CompilerParams(
            dimension_semantics=("parallel", "parallel")),
    )(xp)
    if (Mp, Np) != (M, N):
        out = out[:M, :N]
    return out


# ----------------------------------------------------------------------------
# Wrapped "modules"
# ----------------------------------------------------------------------------

class LinearModule:
    """torch.nn.Linear equivalent.

    Weights are padded to 128-aligned feature dims and pre-cast to the MXU
    compute dtype (bf16 by default) ONCE at construction, so no per-call pad /
    cast HBM pass.  The Pallas kernel fuses matmul + bias with an optional
    tanh activation and an optional scalar scale epilogue (all in f32)."""

    def __init__(self, key, d_in, d_out, *, compute_dtype=jnp.bfloat16,
                 activation=None):
        kw, kb = jax.random.split(key)
        bound = 1.0 / (d_in ** 0.5)
        w = jax.random.uniform(kw, (d_in, d_out), jnp.float32, -bound, bound)
        b = jax.random.uniform(kb, (1, d_out), jnp.float32, -bound, bound)
        self.d_in, self.d_out = d_in, d_out
        self.compute_dtype = compute_dtype
        self.activation = activation
        # Logical parameters (these bf16 values ARE the model's weights).
        self.w = w.astype(compute_dtype)
        self.b = b                                    # bias kept f32
        # Pre-padded, pre-cast copies used by the kernels.
        d_in_p, d_out_p = _round_up(d_in, 128), _round_up(d_out, 128)
        self.w_pad = jnp.pad(self.w, ((0, d_in_p - d_in), (0, d_out_p - d_out)))
        self.b_pad = jnp.pad(self.b, ((0, 0), (0, d_out_p - d_out)))

    def __call__(self, x, scale=None, activation=None, compute_dtype=None):
        act = activation if activation is not None else self.activation
        w_pad = self.w_pad
        if compute_dtype is not None and jnp.dtype(compute_dtype) != w_pad.dtype:
            w_pad = w_pad.astype(compute_dtype)       # rare per-call override
        return pallas_linear(x, w_pad, self.b_pad, out_dim=self.d_out,
                             scale=scale, activation=act)


class TanhModule:
    """torch.nn.Tanh equivalent; prefer LinearModule(..., activation='tanh')
    (or the fused Linear->Linear path) to avoid a separate HBM pass."""

    def __call__(self, x):
        return pallas_tanh(x)


# ----------------------------------------------------------------------------
# Faithful port of the composition machinery (pure Python dispatch, no compute)
# ----------------------------------------------------------------------------

def get_composed_args(composable, args, kwargs, tag_kwargs):
    new_args = []
    new_kwargs = {}
    if composable._composable_is_main:
        new_args.extend(args)
        new_kwargs.update(kwargs)
    if tag_kwargs:
        new_kwargs['tag_kwargs'] = tag_kwargs
    return (new_args, new_kwargs)


_FUSABLE_KEYS = frozenset({"scale", "activation", "compute_dtype"})


def _resolve_linear_call(comp, args, kwargs, tag_kwargs):
    """Mirror get_composed_args + Composable.forward kwarg resolution for a
    Composable wrapping a LinearModule, WITHOUT calling it.  Returns the
    effective call kwargs, or None if the call cannot be fused safely."""
    if not (type(comp) is Composable and isinstance(comp.module, LinearModule)):
        return None
    c_args, c_kwargs = get_composed_args(comp, args, kwargs, tag_kwargs)
    if c_args:
        return None
    c_kwargs = dict(c_kwargs)
    tk = c_kwargs.pop('tag_kwargs', None)
    merged = dict(c_kwargs)
    if tk:
        for tag in comp._composable_tags:
            if tag in tk:
                merged.update(tk[tag])
    if set(comp._composable_kwargs) & set(merged):
        return None                      # duplicate kwarg: let generic path raise
    final = {**comp._composable_kwargs, **merged}
    if not set(final) <= _FUSABLE_KEYS:
        return None
    return final


class BasicComposable:

    def __init__(self, main):
        self._composable_is_main = main

    def __matmul__(self, other) -> 'Composed':
        if not isinstance(other, BasicComposable):
            other = Composable(other)
        return Composed(self, other)

    def __call__(self, *args, **kwargs):
        return self.forward(*args, **kwargs)


class Composed(BasicComposable):

    def __init__(self, first, second):
        super().__init__(first._composable_is_main or second._composable_is_main)
        self.first = first
        self.second = second

    def forward(self, x, *args, tag_kwargs=None, **kwargs):
        # Fast path: Linear -> Linear fuses into a single pallas_call that
        # keeps the hidden activation resident in VMEM.  Falls back to the
        # generic (original-semantics) dispatch whenever anything doesn't fit.
        fused = self._try_fused_mlp(x, args, kwargs, tag_kwargs)
        if fused is not None:
            return fused
        first_args, first_kwargs = get_composed_args(self.first, args, kwargs, tag_kwargs)
        second_args, second_kwargs = get_composed_args(self.second, args, kwargs, tag_kwargs)
        return self.second(
            self.first(x, *first_args, **first_kwargs),
            *second_args, **second_kwargs)

    def _try_fused_mlp(self, x, args, kwargs, tag_kwargs):
        if not hasattr(x, "ndim") or x.ndim != 2:
            return None
        kw1 = _resolve_linear_call(self.first, args, kwargs, tag_kwargs)
        kw2 = _resolve_linear_call(self.second, args, kwargs, tag_kwargs)
        if kw1 is None or kw2 is None:
            return None
        lin1, lin2 = self.first.module, self.second.module
        if lin1.d_out != lin2.d_in:
            return None
        return pallas_mlp(x, lin1, lin2, kw1, kw2)


class Composable(BasicComposable):

    def __init__(self, module, main=False, tags=None, kwargs=None):
        super().__init__(main)
        self.module = module
        self._composable_tags = tags if tags is not None else set()
        self._composable_kwargs = kwargs if kwargs is not None else {}

    def forward(self, *args, tag_kwargs=None, **kwargs):
        if tag_kwargs:
            for tag in self._composable_tags:
                if tag in tag_kwargs:
                    kwargs.update(tag_kwargs[tag])
        return self.module(*args, **self._composable_kwargs, **kwargs)

    def main(self) -> 'Composable':
        self._composable_is_main = True
        return self

    def tag(self, tag: str) -> 'Composable':
        self._composable_tags.add(tag)
        return self

    def kwargs(self, **kwargs: Any) -> 'Composable':
        self._composable_kwargs.update(kwargs)
        return self


# ----------------------------------------------------------------------------
# Demo / self-test
# ----------------------------------------------------------------------------

if __name__ == "__main__":
    key = jax.random.PRNGKey(0)
    kx, k1, k2 = jax.random.split(key, 3)

    B, D_in, D_hid, D_out = 8, 32, 64, 32
    x = jax.random.normal(kx, (B, D_in), jnp.float32)

    lin1 = LinearModule(k1, D_in, D_hid)     # bf16 weights by default
    lin2 = LinearModule(k2, D_hid, D_out)

    # Pure-JAX reference using the (bf16-valued) weights in f32.
    w1f, b1f = lin1.w.astype(jnp.float32), lin1.b
    w2f, b2f = lin2.w.astype(jnp.float32), lin2.b
    ref = jnp.tanh(x @ w1f + b1f)
    ref = (ref @ w2f + b2f) * 2.0

    # (1) Fused Linear->Linear chain (default bf16 MXU, f32 epilogue): tanh via
    #     Composable kwargs, scale via tag_kwargs -> ONE pallas_call total.
    fused = (
        Composable(lin1).main().kwargs(activation="tanh")
        @ Composable(lin2).tag("scaled")
    )
    out_fused = jax.block_until_ready(
        fused(x, tag_kwargs={"scaled": {"scale": 2.0}}))
    assert out_fused.shape == (B, D_out)
    assert jnp.allclose(out_fused, ref, atol=3e-2, rtol=3e-2)

    # (2) Same chain with an explicit f32 compute dtype -> tight numerics.
    fused_f32 = (
        Composable(lin1).main().kwargs(activation="tanh",
                                       compute_dtype=jnp.float32)
        @ Composable(lin2).tag("scaled").kwargs(compute_dtype=jnp.float32)
    )
    out_f32 = jax.block_until_ready(
        fused_f32(x, tag_kwargs={"scaled": {"scale": 2.0}}))
    assert jnp.allclose(out_f32, ref, atol=1e-4, rtol=1e-4)

    # (3) Generic (unfused) composition of arbitrary modules still works and
    #     matches: Linear -> Tanh -> Linear (three pallas_calls).
    unfused = (
        Composable(lin1).main().kwargs(compute_dtype=jnp.float32)
        @ Composable(TanhModule())
        @ Composable(lin2).tag("scaled").kwargs(compute_dtype=jnp.float32)
    )
    out_unfused = jax.block_until_ready(
        unfused(x, tag_kwargs={"scaled": {"scale": 2.0}}))
    assert jnp.allclose(out_unfused, ref, atol=1e-4, rtol=1e-4)
    assert jnp.allclose(out_unfused, out_f32, atol=1e-4, rtol=1e-4)

    # (4) Multi-K accumulator path of the single-linear kernel (tk < Kp).
    k3, k4 = jax.random.split(jax.random.PRNGKey(1))
    lin3 = LinearModule(k3, 256, 48)
    x3 = jax.random.normal(k4, (16, 256), jnp.float32)
    out3 = jax.block_until_ready(
        pallas_linear(x3, lin3.w_pad, lin3.b_pad, out_dim=48,
                      activation="tanh", tk=128))
    ref3 = jnp.tanh(x3 @ lin3.w.astype(jnp.float32) + lin3.b)
    assert out3.shape == (16, 48)
    assert jnp.allclose(out3, ref3, atol=3e-2, rtol=3e-2)

    print("KERNEL_OK")
</pallas_src>

<mosaic_0001>
module attributes {stable_mosaic.version = 11 : i64} {
  func.func @_mlp_kernel(%arg0: i32, %arg1: memref<8x128xbf16, #tpu.memory_space<vmem>>, %arg2: memref<128x128xbf16, #tpu.memory_space<vmem>>, %arg3: memref<1x128xf32, #tpu.memory_space<vmem>>, %arg4: memref<128x128xbf16, #tpu.memory_space<vmem>>, %arg5: memref<1x128xf32, #tpu.memory_space<vmem>>, %arg6: memref<1x1xf32, #tpu.memory_space<smem>>, %arg7: memref<8x128xf32, #tpu.memory_space<vmem>>) attributes {dimension_semantics = [#tpu.dimension_semantics<parallel>], iteration_bounds = array<i64: 1>, scalar_prefetch = 0 : i64, scratch_operands = 0 : i64, tpu.core_type = #tpu.core_type<tc>, window_params = [{transform_indices = @transform_0, window_bounds = array<i64: 8, 128>}, {pipeline_mode = #tpu.pipeline_mode<synchronous>, transform_indices = @transform_1, window_bounds = array<i64: 128, 128>}, {pipeline_mode = #tpu.pipeline_mode<synchronous>, transform_indices = @transform_2, window_bounds = array<i64: 1, 128>}, {pipeline_mode = #tpu.pipeline_mode<synchronous>, transform_indices = @transform_3, window_bounds = array<i64: 128, 128>}, {pipeline_mode = #tpu.pipeline_mode<synchronous>, transform_indices = @transform_4, window_bounds = array<i64: 1, 128>}, {transform_indices = @transform_5, window_bounds = array<i64: 1, 1>}, {transform_indices = @transform_6, window_bounds = array<i64: 8, 128>}]} {
    %c0 = arith.constant 0 : index
    %c0_0 = arith.constant 0 : index
    %0 = vector.load %arg1[%c0, %c0_0] : memref<8x128xbf16, #tpu.memory_space<vmem>>, vector<8x128xbf16>
    %c0_1 = arith.constant 0 : index
    %c0_2 = arith.constant 0 : index
    %1 = vector.load %arg2[%c0_1, %c0_2] : memref<128x128xbf16, #tpu.memory_space<vmem>>, vector<128x128xbf16>
    %cst = arith.constant dense<0.000000e+00> : vector<8x128xf32>
    %2 = tpu.matmul %0, %1, %cst {dimension_numbers = #tpu.dot_dimension_numbers<[1], [0], [0], [1], [0, 0, 1, 1], [], []>} : vector<8x128xbf16>, vector<128x128xbf16>, vector<8x128xf32> -> vector<8x128xf32>
    %c0_3 = arith.constant 0 : index
    %c0_4 = arith.constant 0 : index
    %3 = vector.load %arg3[%c0_3, %c0_4] : memref<1x128xf32, #tpu.memory_space<vmem>>, vector<1x128xf32>
    %4 = vector.broadcast %3 : vector<1x128xf32> to vector<8x128xf32>
    %5 = arith.addf %2, %4 : vector<8x128xf32>
    %6 = math.tanh %5 : vector<8x128xf32>
    %7 = arith.truncf %6 : vector<8x128xf32> to vector<8x128xbf16>
    %c0_5 = arith.constant 0 : index
    %c0_6 = arith.constant 0 : index
    %8 = vector.load %arg4[%c0_5, %c0_6] : memref<128x128xbf16, #tpu.memory_space<vmem>>, vector<128x128xbf16>
    %cst_7 = arith.constant dense<0.000000e+00> : vector<8x128xf32>
    %9 = tpu.matmul %7, %8, %cst_7 {dimension_numbers = #tpu.dot_dimension_numbers<[1], [0], [0], [1], [0, 0, 1, 1], [], []>} : vector<8x128xbf16>, vector<128x128xbf16>, vector<8x128xf32> -> vector<8x128xf32>
    %c0_8 = arith.constant 0 : index
    %c0_9 = arith.constant 0 : index
    %10 = vector.load %arg5[%c0_8, %c0_9] : memref<1x128xf32, #tpu.memory_space<vmem>>, vector<1x128xf32>
    %11 = vector.broadcast %10 : vector<1x128xf32> to vector<8x128xf32>
    %12 = arith.addf %9, %11 : vector<8x128xf32>
    %c0_10 = arith.constant 0 : index
    %c0_11 = arith.constant 0 : index
    %13 = memref.load %arg6[%c0_10, %c0_11] : memref<1x1xf32, #tpu.memory_space<smem>>
    %14 = vector.broadcast %13 : f32 to vector<8x128xf32>
    %15 = arith.mulf %12, %14 : vector<8x128xf32>
    %c0_12 = arith.constant 0 : index
    %c0_13 = arith.constant 0 : index
    %16 = vector.load %arg7[%c0_12, %c0_13] : memref<8x128xf32, #tpu.memory_space<vmem>>, vector<8x128xf32>
    tpu.vector_store %arg7[%c0_12, %c0_13], %15 {strides = array<i32>} : memref<8x128xf32, #tpu.memory_space<vmem>>, vector<8x128xf32>,
    return
  }
  func.func @transform_0(%arg0: i32) -> (i32, i32) {
    %c0_i32 = arith.constant 0 : i32
    %c0_i32_0 = arith.constant 0 : i32
    return %arg0, %c0_i32 : i32, i32
  }
  func.func @transform_1(%arg0: i32) -> (i32, i32) {
    %c0_i32 = arith.constant 0 : i32
    %c0_i32_0 = arith.constant 0 : i32
    %c0_i32_1 = arith.constant 0 : i32
    return %c0_i32, %c0_i32_0 : i32, i32
  }
  func.func @transform_2(%arg0: i32) -> (i32, i32) {
    %c0_i32 = arith.constant 0 : i32
    %c0_i32_0 = arith.constant 0 : i32
    %c0_i32_1 = arith.constant 0 : i32
    return %c0_i32, %c0_i32_0 : i32, i32
  }
  func.func @transform_3(%arg0: i32) -> (i32, i32) {
    %c0_i32 = arith.constant 0 : i32
    %c0_i32_0 = arith.constant 0 : i32
    %c0_i32_1 = arith.constant 0 : i32
    return %c0_i32, %c0_i32_0 : i32, i32
  }
  func.func @transform_4(%arg0: i32) -> (i32, i32) {
    %c0_i32 = arith.constant 0 : i32
    %c0_i32_0 = arith.constant 0 : i32
    %c0_i32_1 = arith.constant 0 : i32
    return %c0_i32, %c0_i32_0 : i32, i32
  }
  func.func @transform_5(%arg0: i32) -> (i32, i32) {
    %c0_i32 = arith.constant 0 : i32
    %c0_i32_0 = arith.constant 0 : i32
    %c0_i32_1 = arith.constant 0 : i32
    return %c0_i32, %c0_i32_0 : i32, i32
  }
  func.func @transform_6(%arg0: i32) -> (i32, i32) {
    %c0_i32 = arith.constant 0 : i32
    %c0_i32_0 = arith.constant 0 : i32
    return %arg0, %c0_i32 : i32, i32
  }
}

</mosaic_0001>

<bundles_post_ra>
// kernel: tpu_custom_call.1
= control target key start
LH: loop header
LB: loop body
LE: loop exit
PB: predicated region body
PF: predicated region fallthrough
CT: control target
= control target key end

     0   :  { %12 = vsyncpa [#allocation4], 0  ;;  %s511_s0 = inlined_call_operand.hbm [shape: bf16[8,128], index: 0, kind: input, shape index: {}]   ;;  %s512_s1 = inlined_call_operand.hbm [shape: bf16[128,128], index: 1, kind: input, shape index: {}]   ;;  %s513_s2 = inlined_call_operand.vmem [shape: f32[1,128], index: 2, kind: input, shape index: {}]   ;;  %s514_s3 = inlined_call_operand.hbm [shape: bf16[128,128], index: 3, kind: input, shape index: {}]   ;;  %s515_s4 = inlined_call_operand.vmem [shape: f32[1,128], index: 4, kind: input, shape index: {}]   ;;  %s516_s5 = inlined_call_operand.<no memory space> [shape: f32[1,1], index: 5, kind: input, shape index: {}]   ;;  %s517_s6 = inlined_call_operand.hbm [shape: f32[8,128], index: 6, kind: output, shape index: {}]  }
   0x1   :  { %13 = vsyncpa [#allocation7], 0  ;;  %s30_s23 = sshll.u32 %s512_s1, 4  ;;  %s31_s23 = int_to_ptr.hbm [resolvable:$true] %s30_s23 }
   0x2   :  { %14 = vsyncpa [#allocation5], 0  ;;  %s449_s24 = smov [#allocation6]   ;;  %s20_s28 = sshll.u32 %s511_s0, 4  ;;  %s21_s28 = int_to_ptr.hbm [resolvable:$true] %s20_s28 }
   0x3   :  { %s32_s25 = sshll.u32 %s449_s24, 4  ;;  %s450_s29 = smov 64   ;;  %s33_s25 = int_to_ptr.vmem [resolvable:$true] %s32_s25 }
   0x4   :  { %s451_s30 = smov 4   ;;  %s452_s7 = smov [#allocation3]  }
   0x5   :  { %38 = dma.hbm_to_vmem [thread:$0]  %s31_s23, 1024, %s33_s25, [#allocation7], %s450_s29, %s450_s29, %s451_s30  }
   0x6   :  { %s22_s8 = sshll.u32 %s452_s7, 4  ;;  %s45_s11 = sshll.u32 %s514_s3, 4  ;;  %s23_s8 = int_to_ptr.vmem [resolvable:$true] %s22_s8  ;;  %s46_s11 = int_to_ptr.hbm [resolvable:$true] %s45_s11 }
   0x7   :  { %25 = dma.hbm_to_vmem [thread:$0]  %s21_s28, 64, %s23_s8, [#allocation4]  }
   0x8   :  { %s453_s1 = smov [#allocation8]  }
   0x9   :  { %s47_s12 = sshll.u32 %s453_s1, 4  ;;  %s48_s12 = int_to_ptr.vmem [resolvable:$true] %s47_s12 }
   0xa   :  { %53 = dma.hbm_to_vmem [thread:$0]  %s46_s11, 1024, %s48_s12, [#allocation7], %s450_s29, %s450_s29, %s451_s30  }
   0xb   :  { %443 = dma.done.wait [#allocation4], 64  }
   0xc   :  { %444 = vsyncadd [#allocation4], 4294967232 }
   0xd   :  { %445 = dma.done.wait [#allocation7], 2048  }
   0xe   :  { %446 = vsyncadd [#allocation7], 4294965248  ;;  %v328_v0 = vld [vmem:[#allocation6 + $0x38] sm:$0xff]  ;;  %v327_v1 = vld [vmem:[#allocation6 + $0x30] sm:$0xff]  ;;  %v236_v25 = vstv %s516_s5  ;;  %s454_s17 = smov [#allocation9]   ;;  %s246_s20 = sshll.u32 %s517_s6, 4  ;;  %s247_s20 = int_to_ptr.hbm [resolvable:$true] %s246_s20 }
   0xf   :  { %139 = vmatpush.bf16.msra.mxu0 %v328_v0  ;;  %v336_v2 = vld [vmem:[#allocation8 + $0x38] sm:$0xff]  ;;  %v335_v3 = vld [vmem:[#allocation8 + $0x30] sm:$0xff]  ;;  %v326_v4 = vld [vmem:[#allocation6 + $0x28] sm:$0xff]  ;;  %s244_s18 = sshll.u32 %s454_s17, 4  ;;  %s245_s18 = int_to_ptr.vmem [resolvable:$true] %s244_s18 }
  0x10   :  { %222 = vmatpush.bf16.msra.mxu1 %v336_v2  ;;  %v334_v5 = vld [vmem:[#allocation8 + $0x28] sm:$0xff]  ;;  %v325_v6 = vld [vmem:[#allocation6 + $0x20] sm:$0xff]  ;;  %v324_v8 = vld [vmem:[#allocation6 + $0x18] sm:$0xff] }
  0x11   :  { %v333_v7 = vld [vmem:[#allocation8 + $0x20] sm:$0xff]  ;;  %v332_v9 = vld [vmem:[#allocation8 + $0x18] sm:$0xff]  ;;  %v323_v10 = vld [vmem:[#allocation6 + $0x10] sm:$0xff] }
  0x12   :  { %v322_v11 = vld [vmem:[#allocation6 + $0x8] sm:$0xff]  ;;  %v321_v12 = vld [vmem:[#allocation6] sm:$0xff]  ;;  %v70_v13 = vld [vmem:[#allocation3] sm:$0xf] }
  0x13   :  { %140 = vmatpush.bf16.msra.mxu0 %v327_v1  ;;  %v331_v14 = vld [vmem:[#allocation8 + $0x10] sm:$0xff]  ;;  %v330_v15 = vld [vmem:[#allocation8 + $0x8] sm:$0xff]  ;;  %v329_v16 = vld [vmem:[#allocation8] sm:$0xff] }
  0x14   :  { %223 = vmatpush.bf16.msra.mxu1 %v335_v3  ;;  %v343_v17 = vld [vmem:[%s513_s2] ss:$0 sm:$0xff] }
  0x15   :  { %v344_v23 = vld [vmem:[%s515_s4] ss:$0 sm:$0xff] }
  0x17   :  { %141 = vmatpush.bf16.msra.mxu0 %v326_v4 }
  0x18   :  { %224 = vmatpush.bf16.msra.mxu1 %v334_v5 }
  0x1b   :  { %142 = vmatpush.bf16.msra.mxu0 %v325_v6 }
  0x1c   :  { %225 = vmatpush.bf16.msra.mxu1 %v333_v7 }
  0x1f   :  { %143 = vmatpush.bf16.msra.mxu0 %v324_v8 }
  0x20   :  { %226 = vmatpush.bf16.msra.mxu1 %v332_v9 }
  0x23   :  { %144 = vmatpush.bf16.msra.mxu0 %v323_v10 }
  0x24   :  { %227 = vmatpush.bf16.msra.mxu1 %v331_v14 }
  0x27   :  { %145 = vmatpush.bf16.msra.mxu0 %v322_v11 }
  0x28   :  { %228 = vmatpush.bf16.msra.mxu1 %v330_v15 }
  0x2b   :  { %146 = vmatpush.bf16.msra.mxu0 %v321_v12 }
  0x2c   :  { %229 = vmatpush.bf16.msra.mxu1 %v329_v16 }
  0x2e   :  { %147 = vmatmul.bf16.vlgmr.msra.gmra.mxu0 %v70_v13 }
  0xab   :  { %v148_v18 = vpop.f32.mrf.mxu0 }
  0xac   :  { %v149_v19 = vadd.f32 %v343_v17, %v148_v18 }
  0xae   :  { %345 = vtanh.f32 %v149_v19 }
  0xb3   :  { %v150_v20 = vpop.f32.mrf.mxu0 }
  0xb4   :  { %v346_v21 = vpop.eup %345 }
  0xb5   :  { %v153_v22 = vpack.c.bf16 %v346_v21, %v346_v21 }
  0xb7   :  { %230 = vmatmul.bf16.vlgmr.msra.gmra.mxu1 %v153_v22 }
 0x134   :  { %v231_v24 = vpop.f32.mrf.mxu1 }
 0x135   :  { %v232_v26 = vadd.f32 %v344_v23, %v231_v24 }
 0x137   :  { %v237_v27 = vmul.f32 %v236_v25, %v232_v26 }
 0x139   :  { %238 = vst [vmem:[#allocation9] sm:$0xff] %v237_v27 }
 0x13a   :  { %249 = dma.vmem_to_hbm [thread:$0]  %s245_s18, 128, %s247_s20, [#allocation5]  }
 0x13c   :  { %v233_v28 = vpop.f32.mrf.mxu1 }
 0x13d   :  { %447 = dma.done.wait [#allocation5], 128  }
 0x13e   :  { %448 = vsyncadd [#allocation5], 4294967168 }
 0x13f   :  { %254 = vsyncpa [#allocation4], 1 }
 0x140   :  { %255 = vsyncpa [#allocation7], 1 }
 0x141   :  { %256 = vsyncpa [#allocation5], 1 }

</bundles_post_ra>
